<compile_context>
chip_gen: v6e
topology: v6e:2x2x1
jax: 0.10.0
libtpu: 0.0.40
codegen_flags: <defaults>
</compile_context>

<pallas_src>
import math
import functools

import jax
import jax.numpy as jnp
from jax.experimental import pallas as pl
from jax.experimental.pallas import tpu as pltpu


# --------------------------------------------------------------------------
# small helpers
# --------------------------------------------------------------------------
def _round_up(n, m):
    return ((n + m - 1) // m) * m


def _pad2(a, rows, cols):
    return jnp.pad(a, ((0, rows - a.shape[0]), (0, cols - a.shape[1])))


def _largest_divisor_leq(n, cap):
    """Largest divisor of n that is <= cap (>=1)."""
    for cand in range(min(cap, n), 0, -1):
        if n % cand == 0:
            return cand
    return 1


def _gru_vmem_bytes(tc, bp, hp, mm_bytes):
    """Rough VMEM footprint of one recurrence grid step (double-buffered I/O)."""
    weights = 2 * 6 * hp * hp * mm_bytes      # [W_i(3Hp)|W_hrz(2Hp)|W_hn(Hp)], 2 bufs
    x_blk = 2 * tc * bp * hp * mm_bytes       # input chunk, double-buffered
    o_blk = 2 * tc * bp * hp * 4              # f32 output chunk, double-buffered
    scratch = tc * bp * 3 * hp * 4 + bp * hp * 4   # gates scratch + carried h
    return weights + x_blk + o_blk + scratch


# --------------------------------------------------------------------------
# PermutationMatrix.forward -> output_lower  (H, H)
# --------------------------------------------------------------------------
def perm_matrix_kernel(m_ref, lbar_t_ref, out_ref, *, temperature, unroll, hidden_size):
    H = hidden_size
    M = m_ref[...].astype(jnp.float32)                                # (H, H)
    matrix = jnp.exp(temperature * (M - jnp.max(M, axis=1, keepdims=True)))

    row = jax.lax.broadcasted_iota(jnp.int32, (H, H), 0)
    col = jax.lax.broadcasted_iota(jnp.int32, (H, H), 1)
    # Build L^T directly from the pre-transposed lbar (sigmoid is elementwise,
    # tril mask transposes to row<=col). Lets us return P @ L^T @ P^T, which
    # equals (P @ L @ P^T)^T, without a final HxH transpose.
    lower_t = jax.nn.sigmoid(lbar_t_ref[...].astype(jnp.float32)) * \
        (row <= col).astype(jnp.float32)

    for _ in range(unroll):                     # static Python unroll count
        matrix = matrix / jnp.sum(matrix, axis=1, keepdims=True)
        matrix = matrix / jnp.sum(matrix, axis=0, keepdims=True)

    plt_ = jnp.dot(matrix, lower_t, preferred_element_type=jnp.float32)
    out = jnp.dot(plt_, matrix.T, preferred_element_type=jnp.float32)
    out_ref[...] = out.astype(out_ref.dtype)


def permutation_matrix_forward(matrix_param, lower_param, epoch, init_temp, init_unroll):
    H = matrix_param.shape[0]
    temperature = float((epoch // 10 + 1) * init_temp)
    unroll = int((epoch // 10 + 1) * init_unroll)
    kernel = functools.partial(
        perm_matrix_kernel, temperature=temperature, unroll=unroll, hidden_size=H)
    return pl.pallas_call(
        kernel,
        out_shape=jax.ShapeDtypeStruct((H, H), jnp.float32),
    )(matrix_param, lower_param.T)              # one-time host-side transpose of lbar


# --------------------------------------------------------------------------
# Fused GRU recurrence: serial grid over time chunks, h carried in VMEM scratch
# Per chunk: one big input-projection matmul (MXU) + Tc serial recurrence steps.
# --------------------------------------------------------------------------
def gru_fused_kernel(x_ref, wi_ref, whrz_ref, whn_ref, o_ref, h_ref, g_ref,
                     *, tc, b, hidden, unroll):
    # h_ref persists across grid steps; valid only because the time axis is
    # "arbitrary" (sequential) — do not mark it parallel.
    @pl.when(pl.program_id(0) == 0)
    def _():
        h_ref[...] = jnp.zeros_like(h_ref)

    # Fused input projection for the whole chunk: (Tc*Bp, Hp) x (Hp, 3Hp).
    # Bp is a multiple of 8, so the reshape is layout-preserving.
    x2d = x_ref[...].reshape(tc * b, hidden)
    g_ref[...] = jnp.dot(
        x2d, wi_ref[...], preferred_element_type=jnp.float32
    ).reshape(tc, b, 3 * hidden)

    wdt = whrz_ref.dtype

    def step(i, h):                               # h: (Bp, Hp) f32
        g = g_ref[i]                              # (Bp, 3Hp) f32, precomputed above
        # Weight refs read inside the step: lets the compiler hoist when they
        # fit the vreg file instead of forcing spills on the serial path.
        hrz = jnp.dot(h.astype(wdt), whrz_ref[...],
                      preferred_element_type=jnp.float32)             # (Bp, 2Hp)
        r = jax.nn.sigmoid(g[:, :hidden] + hrz[:, :hidden])
        z = jax.nn.sigmoid(g[:, hidden:2 * hidden] + hrz[:, hidden:])
        n = jnp.tanh(g[:, 2 * hidden:]
                     + jnp.dot((r * h).astype(wdt), whn_ref[...],
                               preferred_element_type=jnp.float32))
        h_new = h * z + (1.0 - z) * n
        o_ref[pl.ds(i, 1)] = h_new[None].astype(o_ref.dtype)          # unmasked vst
        return h_new

    # Bounded unroll (divides tc) — amortizes loop overhead without blowing
    # instruction memory / vreg pressure when tc is large.
    h_ref[...] = jax.lax.fori_loop(0, tc, step, h_ref[...], unroll=unroll)


def gru_recurrence(x_p, w_i, w_hrz, w_hn, *, time_chunk, unroll, vmem_limit):
    T, Bp, Hp = x_p.shape
    kern = functools.partial(gru_fused_kernel, tc=time_chunk, b=Bp, hidden=Hp,
                             unroll=unroll)
    return pl.pallas_call(
        kern,
        out_shape=jax.ShapeDtypeStruct((T, Bp, Hp), jnp.float32),
        grid=(T // time_chunk,),
        in_specs=[
            pl.BlockSpec((time_chunk, Bp, Hp), lambda c: (c, 0, 0)),
            pl.BlockSpec((Hp, 3 * Hp), lambda c: (0, 0)),  # constant block (no re-DMA)
            pl.BlockSpec((Hp, 2 * Hp), lambda c: (0, 0)),  # constant block
            pl.BlockSpec((Hp, Hp), lambda c: (0, 0)),      # constant block
        ],
        out_specs=pl.BlockSpec((time_chunk, Bp, Hp), lambda c: (c, 0, 0)),
        scratch_shapes=[
            pltpu.VMEM((Bp, Hp), jnp.float32),               # carried hidden state
            pltpu.VMEM((time_chunk, Bp, 3 * Hp), jnp.float32),  # per-chunk gates
        ],
        compiler_params=pltpu.CompilerParams(
            dimension_semantics=("arbitrary",),              # recurrence: sequential
            vmem_limit_bytes=vmem_limit),
    )(x_p, w_i, w_hrz, w_hn)


# --------------------------------------------------------------------------
# Full forward
# --------------------------------------------------------------------------
def permuted_gru_forward(input_, epoch, params, *, init_temp, init_unroll,
                         matmul_dtype=jnp.bfloat16, time_chunk=None):
    """input_: (T, B, H) float32. Returns hidden_states (T, B, H) float32."""
    T, B, H = input_.shape
    Hp = _round_up(H, 128)          # lane-dense padded hidden (exact: pads stay 0)
    Bp = _round_up(B, 8)            # full-sublane batch (padded rows stay 0)
    mm_bytes = jnp.dtype(matmul_dtype).itemsize

    # 1) PermutationMatrix forward (one-time setup kernel).
    lower = permutation_matrix_forward(
        params["perm_matrix"], params["perm_lower"], epoch, init_temp, init_unroll)

    # 2) Mask weights, fuse gates, pad H -> Hp (plain JAX glue, one-time).
    def prep(name):
        return _pad2(params[name] * lower, Hp, Hp).astype(matmul_dtype)

    w_i = jnp.concatenate([prep("W_ir"), prep("W_iz"), prep("W_in")], axis=1)  # (Hp,3Hp)
    w_hrz = jnp.concatenate([prep("W_hr"), prep("W_hz")], axis=1)              # (Hp,2Hp)
    w_hn = prep("W_hn")                                                        # (Hp,Hp)

    x_p = jnp.pad(input_, ((0, 0), (0, Bp - B), (0, Hp - H))).astype(matmul_dtype)

    # 3) Time chunk sized against a v7x-safe (64 MiB physical) VMEM budget.
    if time_chunk is None:
        budget = 40 * 1024 * 1024
        tc = _largest_divisor_leq(T, 64)
        while tc > 1 and _gru_vmem_bytes(tc, Bp, Hp, mm_bytes) > budget:
            tc = _largest_divisor_leq(T, tc - 1)
        time_chunk = tc
    unroll = _largest_divisor_leq(time_chunk, 8)
    vmem_limit = int(min(100 * 1024 * 1024,
                         max(32 * 1024 * 1024,
                             1.25 * _gru_vmem_bytes(time_chunk, Bp, Hp, mm_bytes))))

    # 4) Fused projection + serial GRU recurrence over the chunked time grid.
    out_p = gru_recurrence(x_p, w_i, w_hrz, w_hn,
                           time_chunk=time_chunk, unroll=unroll,
                           vmem_limit=vmem_limit)

    return out_p[:, :B, :H]


# --------------------------------------------------------------------------
# Deterministic parameter init (shapes from PermutedGru.__init__)
# --------------------------------------------------------------------------
def init_params(key, hidden_size):
    H = hidden_size
    keys = jax.random.split(key, 8)

    # PermutationMatrix.matrix : kaiming_uniform_(a=sqrt(H))  (fan_in = H)
    gain_u = math.sqrt(2.0 / (1.0 + H))
    bound = gain_u * math.sqrt(3.0 / H)
    perm_matrix = jax.random.uniform(keys[0], (H, H), jnp.float32, -bound, bound)

    # PermutationMatrix.lower : 0.1 * randn
    perm_lower = 0.1 * jax.random.normal(keys[1], (H, H), jnp.float32)

    # GRU weights : kaiming_normal_(a=sqrt(H), mode='fan_out')  (fan_out = H)
    std = math.sqrt(2.0 / ((1.0 + H) * H))

    def w(k):
        return std * jax.random.normal(k, (H, H), jnp.float32)

    return {
        "perm_matrix": perm_matrix,
        "perm_lower": perm_lower,
        "W_ir": w(keys[2]), "W_hr": w(keys[3]),
        "W_iz": w(keys[4]), "W_hz": w(keys[5]),
        "W_in": w(keys[6]), "W_hn": w(keys[7]),
    }


# --------------------------------------------------------------------------
# Pure-JAX reference (mirrors the PyTorch forward) for a sanity check
# --------------------------------------------------------------------------
def _reference_forward(x, epoch, params, *, init_temp, init_unroll):
    H = params["perm_matrix"].shape[0]
    temperature = (epoch // 10 + 1) * init_temp
    unroll = int((epoch // 10 + 1) * init_unroll)
    M = params["perm_matrix"]
    m = jnp.exp(temperature * (M - jnp.max(M, axis=1, keepdims=True)))
    low = jax.nn.sigmoid(params["perm_lower"]) * jnp.tril(jnp.ones((H, H), jnp.float32))
    for _ in range(unroll):
        m = m / jnp.sum(m, axis=1, keepdims=True)
        m = m / jnp.sum(m, axis=0, keepdims=True)
    lower = (m @ low @ m.T).T
    W_ir = params["W_ir"] * lower; W_hr = params["W_hr"] * lower
    W_iz = params["W_iz"] * lower; W_hz = params["W_hz"] * lower
    W_in = params["W_in"] * lower; W_hn = params["W_hn"] * lower
    T_, B, _ = x.shape
    h = jnp.zeros((B, H), jnp.float32)
    outs = []
    for t in range(T_):
        xt = x[t]
        r = jax.nn.sigmoid(xt @ W_ir + h @ W_hr)
        z = jax.nn.sigmoid(xt @ W_iz + h @ W_hz)
        n = jnp.tanh(xt @ W_in + (r * h) @ W_hn)
        h = h * z + (1.0 - z) * n
        outs.append(h)
    return jnp.stack(outs, axis=0)


if __name__ == "__main__":
    T, B, H = 16, 4, 32
    init_temp, init_unroll = 2.0, 5
    epoch = 3

    key = jax.random.PRNGKey(0)
    k_params, k_x = jax.random.split(key)
    params = init_params(k_params, H)
    x = jax.random.normal(k_x, (T, B, H), jnp.float32)     # (seq, batch, hidden)

    hidden_states = permuted_gru_forward(
        x, epoch, params, init_temp=init_temp, init_unroll=init_unroll)
    hidden_states = jax.block_until_ready(hidden_states)

    assert hidden_states.shape == (T, B, H)
    assert bool(jnp.all(jnp.isfinite(hidden_states)))

    ref = _reference_forward(x, epoch, params, init_temp=init_temp, init_unroll=init_unroll)
    # bf16 MXU operands with f32 accumulation/hidden state: slightly looser atol.
    assert bool(jnp.allclose(hidden_states, ref, atol=1e-2, rtol=5e-2)), \
        float(jnp.max(jnp.abs(hidden_states - ref)))

    print("KERNEL_OK")
</pallas_src>

<mosaic_0001>
module attributes {stable_mosaic.version = 11 : i64} {
  func.func @perm_matrix_kernel(%arg0: memref<32x32xf32, #tpu.memory_space<vmem>>, %arg1: memref<32x32xf32, #tpu.memory_space<vmem>>, %arg2: memref<32x32xf32, #tpu.memory_space<vmem>>) attributes {dimension_semantics = [], scalar_prefetch = 0 : i64, scratch_operands = 0 : i64, tpu.core_type = #tpu.core_type<tc>} {
    %c0 = arith.constant 0 : index
    %c0_0 = arith.constant 0 : index
    %0 = vector.load %arg0[%c0, %c0_0] : memref<32x32xf32, #tpu.memory_space<vmem>>, vector<32x32xf32>
    %cst = arith.constant dense<0xFF800000> : vector<32xf32>
    %1 = vector.multi_reduction <maximumf>, %0, %cst [1] : vector<32x32xf32> to vector<32xf32>
    %2 = vector.shape_cast %1 : vector<32xf32> to vector<32x1xf32>
    %3 = vector.broadcast %2 : vector<32x1xf32> to vector<32x32xf32>
    %4 = arith.subf %0, %3 : vector<32x32xf32>
    %cst_1 = arith.constant 2.000000e+00 : f32
    %5 = vector.broadcast %cst_1 : f32 to vector<32x32xf32>
    %6 = arith.mulf %5, %4 : vector<32x32xf32>
    %7 = math.exp %6 : vector<32x32xf32>
    %8 = tpu.iota {dimensions = array<i32: 0>} : vector<32x32xi32>
    %9 = tpu.iota {dimensions = array<i32: 1>} : vector<32x32xi32>
    %c0_2 = arith.constant 0 : index
    %c0_3 = arith.constant 0 : index
    %10 = vector.load %arg1[%c0_2, %c0_3] : memref<32x32xf32, #tpu.memory_space<vmem>>, vector<32x32xf32>
    %11 = arith.negf %10 : vector<32x32xf32>
    %12 = math.exp %11 : vector<32x32xf32>
    %cst_4 = arith.constant 1.000000e+00 : f32
    %13 = vector.broadcast %cst_4 : f32 to vector<32x32xf32>
    %14 = arith.addf %13, %12 : vector<32x32xf32>
    %15 = arith.divf %13, %14 : vector<32x32xf32>
    %16 = arith.cmpi sle, %8, %9 : vector<32x32xi32>
    %17 = arith.extui %16 : vector<32x32xi1> to vector<32x32xi32>
    %18 = arith.sitofp %17 : vector<32x32xi32> to vector<32x32xf32>
    %19 = arith.mulf %15, %18 : vector<32x32xf32>
    %cst_5 = arith.constant dense<0.000000e+00> : vector<32xf32>
    %20 = vector.multi_reduction <add>, %7, %cst_5 [1] : vector<32x32xf32> to vector<32xf32>
    %21 = vector.shape_cast %20 : vector<32xf32> to vector<32x1xf32>
    %22 = vector.broadcast %21 : vector<32x1xf32> to vector<32x32xf32>
    %23 = arith.divf %7, %22 : vector<32x32xf32>
    %cst_6 = arith.constant dense<0.000000e+00> : vector<32xf32>
    %24 = vector.multi_reduction <add>, %23, %cst_6 [0] : vector<32x32xf32> to vector<32xf32>
    %25 = vector.shape_cast %24 : vector<32xf32> to vector<1x32xf32>
    %26 = vector.broadcast %25 : vector<1x32xf32> to vector<32x32xf32>
    %27 = arith.divf %23, %26 : vector<32x32xf32>
    %cst_7 = arith.constant dense<0.000000e+00> : vector<32xf32>
    %28 = vector.multi_reduction <add>, %27, %cst_7 [1] : vector<32x32xf32> to vector<32xf32>
    %29 = vector.shape_cast %28 : vector<32xf32> to vector<32x1xf32>
    %30 = vector.broadcast %29 : vector<32x1xf32> to vector<32x32xf32>
    %31 = arith.divf %27, %30 : vector<32x32xf32>
    %cst_8 = arith.constant dense<0.000000e+00> : vector<32xf32>
    %32 = vector.multi_reduction <add>, %31, %cst_8 [0] : vector<32x32xf32> to vector<32xf32>
    %33 = vector.shape_cast %32 : vector<32xf32> to vector<1x32xf32>
    %34 = vector.broadcast %33 : vector<1x32xf32> to vector<32x32xf32>
    %35 = arith.divf %31, %34 : vector<32x32xf32>
    %cst_9 = arith.constant dense<0.000000e+00> : vector<32xf32>
    %36 = vector.multi_reduction <add>, %35, %cst_9 [1] : vector<32x32xf32> to vector<32xf32>
    %37 = vector.shape_cast %36 : vector<32xf32> to vector<32x1xf32>
    %38 = vector.broadcast %37 : vector<32x1xf32> to vector<32x32xf32>
    %39 = arith.divf %35, %38 : vector<32x32xf32>
    %cst_10 = arith.constant dense<0.000000e+00> : vector<32xf32>
    %40 = vector.multi_reduction <add>, %39, %cst_10 [0] : vector<32x32xf32> to vector<32xf32>
    %41 = vector.shape_cast %40 : vector<32xf32> to vector<1x32xf32>
    %42 = vector.broadcast %41 : vector<1x32xf32> to vector<32x32xf32>
    %43 = arith.divf %39, %42 : vector<32x32xf32>
    %cst_11 = arith.constant dense<0.000000e+00> : vector<32xf32>
    %44 = vector.multi_reduction <add>, %43, %cst_11 [1] : vector<32x32xf32> to vector<32xf32>
    %45 = vector.shape_cast %44 : vector<32xf32> to vector<32x1xf32>
    %46 = vector.broadcast %45 : vector<32x1xf32> to vector<32x32xf32>
    %47 = arith.divf %43, %46 : vector<32x32xf32>
    %cst_12 = arith.constant dense<0.000000e+00> : vector<32xf32>
    %48 = vector.multi_reduction <add>, %47, %cst_12 [0] : vector<32x32xf32> to vector<32xf32>
    %49 = vector.shape_cast %48 : vector<32xf32> to vector<1x32xf32>
    %50 = vector.broadcast %49 : vector<1x32xf32> to vector<32x32xf32>
    %51 = arith.divf %47, %50 : vector<32x32xf32>
    %cst_13 = arith.constant dense<0.000000e+00> : vector<32xf32>
    %52 = vector.multi_reduction <add>, %51, %cst_13 [1] : vector<32x32xf32> to vector<32xf32>
    %53 = vector.shape_cast %52 : vector<32xf32> to vector<32x1xf32>
    %54 = vector.broadcast %53 : vector<32x1xf32> to vector<32x32xf32>
    %55 = arith.divf %51, %54 : vector<32x32xf32>
    %cst_14 = arith.constant dense<0.000000e+00> : vector<32xf32>
    %56 = vector.multi_reduction <add>, %55, %cst_14 [0] : vector<32x32xf32> to vector<32xf32>
    %57 = vector.shape_cast %56 : vector<32xf32> to vector<1x32xf32>
    %58 = vector.broadcast %57 : vector<1x32xf32> to vector<32x32xf32>
    %59 = arith.divf %55, %58 : vector<32x32xf32>
    %cst_15 = arith.constant dense<0.000000e+00> : vector<32x32xf32>
    %60 = tpu.matmul %59, %19, %cst_15 {dimension_numbers = #tpu.dot_dimension_numbers<[1], [0], [0], [1], [0, 0, 1, 1], [], []>} : vector<32x32xf32>, vector<32x32xf32>, vector<32x32xf32> -> vector<32x32xf32>
    %61 = tpu.transpose %59, [1, 0] : vector<32x32xf32> -> vector<32x32xf32>
    %cst_16 = arith.constant dense<0.000000e+00> : vector<32x32xf32>
    %62 = tpu.matmul %60, %61, %cst_16 {dimension_numbers = #tpu.dot_dimension_numbers<[1], [0], [0], [1], [0, 0, 1, 1], [], []>} : vector<32x32xf32>, vector<32x32xf32>, vector<32x32xf32> -> vector<32x32xf32>
    %c0_17 = arith.constant 0 : index
    %c0_18 = arith.constant 0 : index
    %63 = vector.load %arg2[%c0_17, %c0_18] : memref<32x32xf32, #tpu.memory_space<vmem>>, vector<32x32xf32>
    tpu.vector_store %arg2[%c0_17, %c0_18], %62 {strides = array<i32>} : memref<32x32xf32, #tpu.memory_space<vmem>>, vector<32x32xf32>,
    return
  }
}

</mosaic_0001>

<bundles_post_ra>
// kernel: tpu_custom_call.1
= control target key start
LH: loop header
LB: loop body
LE: loop exit
PB: predicated region body
PF: predicated region fallthrough
CT: control target
= control target key end

     0   :  { %7 = vsyncpa [#allocation3], 0  ;;  %s859_s0 = inlined_call_operand.hbm [shape: f32[32,32], index: 0, kind: input, shape index: {}]   ;;  %s860_s1 = inlined_call_operand.hbm [shape: f32[32,32], index: 1, kind: input, shape index: {}]   ;;  %s861_s2 = inlined_call_operand.hbm [shape: f32[32,32], index: 2, kind: output, shape index: {}]  }
   0x1   :  { %8 = vsyncpa [#allocation6], 0 }
   0x2   :  { %9 = vsyncpa [#allocation4], 0  ;;  %s740_s9 = smov [#allocation2]  }
   0x3   :  { %s15_s10 = sshll.u32 %s740_s9, 4  ;;  %s16_s10 = int_to_ptr.vmem [resolvable:$true] %s15_s10 }
   0x4   :  { %s682_s11 = scalar_lea.vmem %s16_s10, 512  ;;  %p687_p1 = scmp.lt.s32.totalorder %s16_s10, %s16_s10 }
   0x5   :  { %p683_p0 = scmp.ne.s32.totalorder %s16_s10, %s682_s11  ;;  %p688_p2 = scmp.lt.s32.totalorder %s682_s11, %s682_s11 }
   0x7   :  { %p689_p3 = por %p688_p2, %p687_p1 }
   0x9   :  { %p690_p4 = pnand %p689_p3, %p683_p0 }
   0xb   :  { %693 = shalt.err (!%p690_p4)
}
   0xc   :  { %s741_s12 = smov 128   ;;  %s742_s13 = smov 8  }
   0xd   :  { %21 = dma.hbm_to_vmem [thread:$0]  %s859_s0, 512, %s16_s10, [#allocation3], %s741_s12, %s741_s12, %s742_s13  }
   0xe   :  { %s743_s16 = smov [#allocation5]  }
   0xf   :  { %s27_s17 = sshll.u32 %s743_s16, 4  ;;  %s28_s17 = int_to_ptr.vmem [resolvable:$true] %s27_s17 }
  0x10   :  { %s702_s18 = scalar_lea.vmem %s28_s17, 512  ;;  %p707_p6 = scmp.lt.s32.totalorder %s28_s17, %s28_s17 }
  0x11   :  { %p703_p5 = scmp.ne.s32.totalorder %s28_s17, %s702_s18  ;;  %p708_p7 = scmp.lt.s32.totalorder %s702_s18, %s702_s18 }
  0x13   :  { %p709_p8 = por %p708_p7, %p707_p6 }
  0x15   :  { %p710_p9 = pnand %p709_p8, %p703_p5 }
  0x17   :  { %713 = shalt.err (!%p710_p9)
}
  0x18   :  { %33 = dma.hbm_to_vmem [thread:$0]  %s860_s1, 512, %s28_s17, [#allocation6], %s741_s12, %s741_s12, %s742_s13  }
  0x19   :  { %734 = dma.done.wait [#allocation3], 512  }
  0x1a   :  { %735 = vsyncadd [#allocation3], 4294966784 }
  0x1b   :  { %736 = dma.done.wait [#allocation6], 512  }
  0x1c   :  { %737 = vsyncadd [#allocation6], 4294966784  ;;  %vm44_vm0 = vcmask 261120   ;;  %v40_v0 = vld [vmem:[#allocation2] sm:$0xff]  ;;  %v42_v1 = vld [vmem:[#allocation2 + $0x10] sm:$0xff]  ;;  %s745_s0 = smov [#allocation7]  }
  0x1d   :  { %v41_v2 = vld [vmem:[#allocation2 + $0x8] sm:$0xff]  ;;  %v45_v3 = vsel %vm44_vm0, %v40_v0, -inf  ;;  %v51_v4 = vsel %vm44_vm0, %v42_v1, -inf  ;;  %v43_v5 = vld [vmem:[#allocation2 + $0x18] sm:$0xff]  ;;  %s517_s1 = sshll.u32 %s745_s0, 4  ;;  %s518_s1 = int_to_ptr.vmem [resolvable:$true] %s517_s1 }
  0x1e   :  { %46 = vmax.xlane.f32.xlu0 %v45_v3  ;;  %52 = vmax.xlane.f32.xlu1 %v51_v4  ;;  %v48_v6 = vsel %vm44_vm0, %v41_v2, -inf  ;;  %v54_v7 = vsel %vm44_vm0, %v43_v5, -inf  ;;  %s714_s21 = scalar_lea.vmem %s518_s1, 512  ;;  %p719_p11 = scmp.lt.s32.totalorder %s518_s1, %s518_s1 }
  0x1f   :  { %p715_p10 = scmp.ne.s32.totalorder %s518_s1, %s714_s21  ;;  %p720_p12 = scmp.lt.s32.totalorder %s714_s21, %s714_s21 }
  0x21   :  { %p721_p13 = por %p720_p12, %p719_p11 }
  0x22   :  { %49 = vmax.xlane.f32.xlu0 %v48_v6  ;;  %55 = vmax.xlane.f32.xlu1 %v54_v7 }
  0x23   :  { %p722_p0 = pnand %p721_p13, %p715_p10 }
  0xa7   :  { %v47_v8 = vpop.xlane.xlu0 %46  ;;  %v53_v9 = vpop.xlane.xlu1 %52 }
  0xa8   :  { %v57_v10 = vsub.f32 %v40_v0, %v47_v8  ;;  %v59_v11 = vsub.f32 %v42_v1, %v53_v9 }
  0xaa   :  { %v61_v12 = vmul.f32 2.0, %v57_v10  ;;  %v63_v13 = vmul.f32 2.0, %v59_v11 }
  0xab   :  { %v50_v14 = vpop.xlane.xlu0 %49  ;;  %v56_v15 = vpop.xlane.xlu1 %55 }
  0xac   :  { %v65_v16 = vmul.f32 1.442695, %v61_v12  ;;  %v69_v17 = vmul.f32 1.442695, %v63_v13  ;;  %v58_v18 = vsub.f32 %v41_v2, %v50_v14  ;;  %v60_v19 = vsub.f32 %v43_v5, %v56_v15 }
  0xae   :  { %600 = vpow2.f32 %v65_v16  ;;  %v62_v20 = vmul.f32 2.0, %v58_v18  ;;  %v64_v21 = vmul.f32 2.0, %v60_v19 }
  0xaf   :  { %602 = vpow2.f32 %v69_v17 }
  0xb0   :  { %v67_v22 = vmul.f32 1.442695, %v62_v20  ;;  %v71_v23 = vmul.f32 1.442695, %v64_v21 }
  0xb2   :  { %604 = vpow2.f32 %v67_v22 }
  0xb3   :  { %606 = vpow2.f32 %v71_v23 }
  0xbb   :  { %v601_v24 = vpop.eup %600 }
  0xbc   :  { %v603_v25 = vpop.eup %602  ;;  %v124_v26 = vsel %vm44_vm0, %v601_v24, 0.0 }
  0xbd   :  { %125 = vadd.xlane.f32.xlu0 %v124_v26  ;;  %v130_v27 = vsel %vm44_vm0, %v603_v25, 0.0 }
  0xbf   :  { %v605_v28 = vpop.eup %604 }
  0xc0   :  { %v607_v29 = vpop.eup %606  ;;  %v127_v30 = vsel %vm44_vm0, %v605_v28, 0.0 }
  0xc1   :  { %131 = vadd.xlane.f32.xlu0 %v130_v27  ;;  %128 = vadd.xlane.f32.xlu1 %v127_v30  ;;  %v133_v31 = vsel %vm44_vm0, %v607_v29, 0.0 }
  0xc5   :  { %134 = vadd.xlane.f32.xlu1 %v133_v31 }
 0x146   :  { %v126_v32 = vpop.xlane.xlu0 %125 }
 0x147   :  { %608 = vrcp.f32 %v126_v32 }
 0x14a   :  { %v129_v33 = vpop.xlane.xlu1 %128  ;;  %v132_v34 = vpop.xlane.xlu0 %131 }
 0x14b   :  { %610 = vrcp.f32 %v129_v33 }
 0x14c   :  { %612 = vrcp.f32 %v132_v34 }
 0x14e   :  { %v135_v35 = vpop.xlane.xlu1 %134 }
 0x14f   :  { %614 = vrcp.f32 %v135_v35 }
 0x154   :  { %v609_v36 = vpop.eup %608 }
 0x155   :  { %v137_v37 = vmul.f32 %v609_v36, %v601_v24 }
 0x157   :  { %v144_v42 = vsel %vm44_vm0, %v137_v37, 0.0 }
 0x158   :  { %v611_v38 = vpop.eup %610 }
 0x159   :  { %v613_v39 = vpop.eup %612  ;;  %v139_v40 = vmul.f32 %v611_v38, %v605_v28 }
 0x15a   :  { %v141_v41 = vmul.f32 %v613_v39, %v603_v25 }
 0x15b   :  { %v145_v43 = vsel %vm44_vm0, %v139_v40, 0.0 }
 0x15c   :  { %v615_v44 = vpop.eup %614  ;;  %v146_v45 = vadd.f32 %v145_v43, %v144_v42  ;;  %v147_v47 = vsel %vm44_vm0, %v141_v41, 0.0 }
 0x15d   :  { %v143_v46 = vmul.f32 %v615_v44, %v607_v29 }
 0x15e   :  { %v148_v48 = vadd.f32 %v147_v47, %v146_v45 }
 0x15f   :  { %v149_v49 = vsel %vm44_vm0, %v143_v46, 0.0 }
 0x160   :  { %v150_v50 = vadd.f32 %v149_v49, %v148_v48 }
 0x162   :  { %v151_v51 = vrot.slane %v150_v50, 4 }
 0x164   :  { %v152_v52 = vadd.f32 %v151_v51, %v150_v50 }
 0x166   :  { %v153_v53 = vrot.slane %v152_v52, 2 }
 0x168   :  { %v154_v54 = vadd.f32 %v153_v53, %v152_v52 }
 0x16a   :  { %v155_v55 = vrot.slane %v154_v54, 1 }
 0x16c   :  { %v156_v56 = vadd.f32 %v155_v55, %v154_v54 }
 0x16e   :  { %616 = vrcp.f32 %v156_v56 }
 0x17b   :  { %v617_v57 = vpop.eup %616 }
 0x17c   :  { %v159_v58 = vmul.f32 %v617_v57, %v139_v40  ;;  %v158_v59 = vmul.f32 %v617_v57, %v137_v37  ;;  %v161_v62 = vmul.f32 %v617_v57, %v143_v46  ;;  %v160_v63 = vmul.f32 %v617_v57, %v141_v41 }
 0x17e   :  { %v165_v60 = vsel %vm44_vm0, %v159_v58, 0.0  ;;  %v162_v61 = vsel %vm44_vm0, %v158_v59, 0.0  ;;  %v171_v0 = vsel %vm44_vm0, %v161_v62, 0.0  ;;  %v168_v1 = vsel %vm44_vm0, %v160_v63, 0.0 }
 0x17f   :  { %166 = vadd.xlane.f32.xlu1 %v165_v60  ;;  %163 = vadd.xlane.f32.xlu0 %v162_v61 }
 0x183   :  { %172 = vadd.xlane.f32.xlu1 %v171_v0  ;;  %169 = vadd.xlane.f32.xlu0 %v168_v1 }
 0x208   :  { %v167_v2 = vpop.xlane.xlu1 %166  ;;  %v164_v3 = vpop.xlane.xlu0 %163 }
 0x209   :  { %618 = vrcp.f32 %v167_v2 }
 0x20a   :  { %620 = vrcp.f32 %v164_v3 }
 0x20c   :  { %v173_v4 = vpop.xlane.xlu1 %172  ;;  %v170_v5 = vpop.xlane.xlu0 %169 }
 0x20d   :  { %622 = vrcp.f32 %v173_v4 }
 0x20e   :  { %624 = vrcp.f32 %v170_v5 }
 0x216   :  { %v619_v6 = vpop.eup %618 }
 0x217   :  { %v621_v7 = vpop.eup %620  ;;  %v177_v8 = vmul.f32 %v619_v6, %v159_v58 }
 0x218   :  { %v175_v9 = vmul.f32 %v621_v7, %v158_v59 }
 0x219   :  { %v183_v12 = vsel %vm44_vm0, %v177_v8, 0.0 }
 0x21a   :  { %v623_v10 = vpop.eup %622  ;;  %v182_v11 = vsel %vm44_vm0, %v175_v9, 0.0 }
 0x21b   :  { %v625_v13 = vpop.eup %624  ;;  %v181_v15 = vmul.f32 %v623_v10, %v161_v62  ;;  %v184_v16 = vadd.f32 %v183_v12, %v182_v11 }
 0x21c   :  { %v179_v14 = vmul.f32 %v625_v13, %v160_v63 }
 0x21d   :  { %v187_v19 = vsel %vm44_vm0, %v181_v15, 0.0 }
 0x21e   :  { %v185_v17 = vsel %vm44_vm0, %v179_v14, 0.0 }
 0x21f   :  { %v186_v18 = vadd.f32 %v185_v17, %v184_v16 }
 0x221   :  { %v188_v20 = vadd.f32 %v187_v19, %v186_v18 }
 0x223   :  { %v189_v21 = vrot.slane %v188_v20, 4 }
 0x225   :  { %v190_v22 = vadd.f32 %v189_v21, %v188_v20 }
 0x227   :  { %v191_v23 = vrot.slane %v190_v22, 2 }
 0x229   :  { %v192_v24 = vadd.f32 %v191_v23, %v190_v22 }
 0x22b   :  { %v193_v25 = vrot.slane %v192_v24, 1 }
 0x22d   :  { %v194_v26 = vadd.f32 %v193_v25, %v192_v24 }
 0x22f   :  { %626 = vrcp.f32 %v194_v26 }
 0x23c   :  { %v627_v27 = vpop.eup %626 }
 0x23d   :  { %v197_v28 = vmul.f32 %v627_v27, %v177_v8  ;;  %v196_v29 = vmul.f32 %v627_v27, %v175_v9  ;;  %v199_v32 = vmul.f32 %v627_v27, %v181_v15  ;;  %v198_v33 = vmul.f32 %v627_v27, %v179_v14 }
 0x23f   :  { %v203_v30 = vsel %vm44_vm0, %v197_v28, 0.0  ;;  %v200_v31 = vsel %vm44_vm0, %v196_v29, 0.0  ;;  %v209_v34 = vsel %vm44_vm0, %v199_v32, 0.0  ;;  %v206_v35 = vsel %vm44_vm0, %v198_v33, 0.0 }
 0x240   :  { %204 = vadd.xlane.f32.xlu1 %v203_v30  ;;  %201 = vadd.xlane.f32.xlu0 %v200_v31 }
 0x244   :  { %210 = vadd.xlane.f32.xlu1 %v209_v34  ;;  %207 = vadd.xlane.f32.xlu0 %v206_v35 }
 0x2c9   :  { %v205_v36 = vpop.xlane.xlu1 %204  ;;  %v202_v37 = vpop.xlane.xlu0 %201 }
 0x2ca   :  { %628 = vrcp.f32 %v205_v36 }
 0x2cb   :  { %630 = vrcp.f32 %v202_v37 }
 0x2cd   :  { %v211_v38 = vpop.xlane.xlu1 %210  ;;  %v208_v39 = vpop.xlane.xlu0 %207 }
 0x2ce   :  { %632 = vrcp.f32 %v211_v38 }
 0x2cf   :  { %634 = vrcp.f32 %v208_v39 }
 0x2d7   :  { %v629_v40 = vpop.eup %628 }
 0x2d8   :  { %v631_v41 = vpop.eup %630  ;;  %v215_v42 = vmul.f32 %v629_v40, %v197_v28  ;;  %v83_v40 = vld [vmem:[#allocation5 + $0x18] sm:$0xff] }
 0x2d9   :  { %v213_v43 = vmul.f32 %v631_v41, %v196_v29  ;;  %v533_v41 = vmul.f32 -1.442695, %v83_v40 }
 0x2da   :  { %v221_v46 = vsel %vm44_vm0, %v215_v42, 0.0 }
 0x2db   :  { %v633_v44 = vpop.eup %632  ;;  %v220_v45 = vsel %vm44_vm0, %v213_v43, 0.0 }
 0x2dc   :  { %v635_v47 = vpop.eup %634  ;;  %v219_v49 = vmul.f32 %v633_v44, %v199_v32  ;;  %v222_v50 = vadd.f32 %v221_v46, %v220_v45  ;;  %v81_v44 = vld [vmem:[#allocation5 + $0x8] sm:$0xff]  ;;  %v80_v46 = vld [vmem:[#allocation5] sm:$0xff] }
 0x2dd   :  { %v217_v48 = vmul.f32 %v635_v47, %v198_v33  ;;  %v531_v45 = vmul.f32 -1.442695, %v81_v44  ;;  %v530_v47 = vmul.f32 -1.442695, %v80_v46 }
 0x2de   :  { %v225_v53 = vsel %vm44_vm0, %v219_v49, 0.0 }
 0x2df   :  { %v223_v51 = vsel %vm44_vm0, %v217_v48, 0.0 }
 0x2e0   :  { %v224_v52 = vadd.f32 %v223_v51, %v222_v50 }
 0x2e2   :  { %v226_v54 = vadd.f32 %v225_v53, %v224_v52 }
 0x2e4   :  { %v227_v55 = vrot.slane %v226_v54, 4 }
 0x2e6   :  { %v228_v56 = vadd.f32 %v227_v55, %v226_v54 }
 0x2e8   :  { %v229_v57 = vrot.slane %v228_v56, 2 }
 0x2ea   :  { %v230_v58 = vadd.f32 %v229_v57, %v228_v56 }
 0x2ec   :  { %v231_v59 = vrot.slane %v230_v58, 1 }
 0x2ee   :  { %v232_v60 = vadd.f32 %v231_v59, %v230_v58 }
 0x2f0   :  { %636 = vrcp.f32 %v232_v60 }
 0x2fd   :  { %v637_v61 = vpop.eup %636 }
 0x2fe   :  { %v235_v62 = vmul.f32 %v637_v61, %v215_v42  ;;  %v234_v63 = vmul.f32 %v637_v61, %v213_v43  ;;  %v237_v2 = vmul.f32 %v637_v61, %v219_v49  ;;  %v236_v3 = vmul.f32 %v637_v61, %v217_v48  ;;  %v82_v42 = vld [vmem:[#allocation5 + $0x10] sm:$0xff] }
 0x2ff   :  { %v532_v43 = vmul.f32 -1.442695, %v82_v42  ;;  %v73_v48 = vlaneseq }
 0x300   :  { %v241_v0 = vsel %vm44_vm0, %v235_v62, 0.0  ;;  %v238_v1 = vsel %vm44_vm0, %v234_v63, 0.0  ;;  %v247_v4 = vsel %vm44_vm0, %v237_v2, 0.0  ;;  %v244_v5 = vsel %vm44_vm0, %v236_v3, 0.0 }
 0x301   :  { %242 = vadd.xlane.f32.xlu1 %v241_v0  ;;  %239 = vadd.xlane.f32.xlu0 %v238_v1  ;;  %v74_v52 = vshrl.u32 %v73_v48, 7  ;;  %v79_v58 = vand.u32 127, %v73_v48 }
 0x303   :  { %v77_v57 = vadd.s32 24, %v74_v52  ;;  %v76_v60 = vadd.s32 16, %v74_v52  ;;  %v75_v61 = vadd.s32 8, %v74_v52  ;;  %vm108_vm4 = vcmp.le.s32.totalorder %v74_v52, %v79_v58 }
 0x305   :  { %248 = vadd.xlane.f32.xlu1 %v247_v4  ;;  %245 = vadd.xlane.f32.xlu0 %v244_v5  ;;  %vm111_vm1 = vcmp.le.s32.totalorder %v77_v57, %v79_v58  ;;  %vm110_vm2 = vcmp.le.s32.totalorder %v76_v60, %v79_v58  ;;  %vm109_vm3 = vcmp.le.s32.totalorder %v75_v61, %v79_v58 }
 0x38a   :  { %v243_v6 = vpop.xlane.xlu1 %242  ;;  %v240_v7 = vpop.xlane.xlu0 %239 }
 0x38b   :  { %638 = vrcp.f32 %v243_v6 }
 0x38c   :  { %640 = vrcp.f32 %v240_v7 }
 0x38e   :  { %v249_v8 = vpop.xlane.xlu1 %248  ;;  %v246_v9 = vpop.xlane.xlu0 %245 }
 0x38f   :  { %642 = vrcp.f32 %v249_v8 }
 0x390   :  { %644 = vrcp.f32 %v246_v9 }
 0x398   :  { %v639_v10 = vpop.eup %638 }
 0x399   :  { %v641_v11 = vpop.eup %640  ;;  %v253_v12 = vmul.f32 %v639_v10, %v235_v62  ;;  %v744_v62 = vmov 0.0  }
 0x39a   :  { %v251_v13 = vmul.f32 %v641_v11, %v234_v63  ;;  %v537_v63 = vsel %vm111_vm1, 1.0, %v744_v62  ;;  %v536_v1 = vsel %vm110_vm2, 1.0, %v744_v62  ;;  %v535_v4 = vsel %vm109_vm3, 1.0, %v744_v62 }
 0x39b   :  { %v259_v16 = vsel %vm44_vm0, %v253_v12, 0.0  ;;  %v534_v7 = vsel %vm108_vm4, 1.0, %v744_v62 }
 0x39c   :  { %v643_v14 = vpop.eup %642  ;;  %v258_v15 = vsel %vm44_vm0, %v251_v13, 0.0 }
 0x39d   :  { %v645_v17 = vpop.eup %644  ;;  %v257_v19 = vmul.f32 %v643_v14, %v237_v2  ;;  %v260_v20 = vadd.f32 %v259_v16, %v258_v15 }
 0x39e   :  { %v255_v18 = vmul.f32 %v645_v17, %v236_v3 }
 0x39f   :  { %v263_v23 = vsel %vm44_vm0, %v257_v19, 0.0 }
 0x3a0   :  { %v261_v21 = vsel %vm44_vm0, %v255_v18, 0.0 }
 0x3a1   :  { %v262_v22 = vadd.f32 %v261_v21, %v260_v20 }
 0x3a3   :  { %v264_v24 = vadd.f32 %v263_v23, %v262_v22 }
 0x3a5   :  { %v265_v25 = vrot.slane %v264_v24, 4 }
 0x3a7   :  { %v266_v26 = vadd.f32 %v265_v25, %v264_v24 }
 0x3a9   :  { %v267_v27 = vrot.slane %v266_v26, 2 }
 0x3ab   :  { %v268_v28 = vadd.f32 %v267_v27, %v266_v26 }
 0x3ad   :  { %v269_v29 = vrot.slane %v268_v28, 1 }
 0x3af   :  { %v270_v30 = vadd.f32 %v269_v29, %v268_v28 }
 0x3b1   :  { %646 = vrcp.f32 %v270_v30 }
 0x3b2   :  { %648 = vpow2.f32 %v533_v41 }
 0x3b3   :  { %650 = vpow2.f32 %v532_v43 }
 0x3b4   :  { %652 = vpow2.f32 %v531_v45 }
 0x3b5   :  { %654 = vpow2.f32 %v530_v47 }
 0x3be   :  { %v647_v31 = vpop.eup %646 }
 0x3bf   :  { %v809_v32 = vmul.f32 %v647_v31, %v253_v12  ;;  %v811_v33 = vmul.f32 %v647_v31, %v251_v13  ;;  %v817_v36 = vmul.f32 %v647_v31, %v257_v19  ;;  %v819_v37 = vmul.f32 %v647_v31, %v255_v18  ;;  %v649_v49 = vpop.eup %648 }
 0x3c0   :  { %v99_v50 = vadd.f32 1.0, %v649_v49  ;;  %v651_v51 = vpop.eup %650 }
 0x3c1   :  { %v279_v34 = vsel %vm44_vm0, %v809_v32, 0.0  ;;  %v276_v35 = vsel %vm44_vm0, %v811_v33, 0.0  ;;  %v285_v38 = vsel %vm44_vm0, %v817_v36, 0.0  ;;  %v282_v39 = vsel %vm44_vm0, %v819_v37, 0.0  ;;  %v653_v54 = vpop.eup %652 }
 0x3c2   :  { %280 = vadd.xlane.f32.xlu1 %v279_v34  ;;  %277 = vadd.xlane.f32.xlu0 %v276_v35  ;;  %656 = vrcp.f32 %v99_v50  ;;  %v98_v53 = vadd.f32 1.0, %v651_v51  ;;  %v97_v55 = vadd.f32 1.0, %v653_v54  ;;  %v655_v56 = vpop.eup %654 }
 0x3c3   :  { %v96_v59 = vadd.f32 1.0, %v655_v56 }
 0x3c4   :  { %658 = vrcp.f32 %v98_v53 }
 0x3c5   :  { %660 = vrcp.f32 %v97_v55 }
 0x3c6   :  { %286 = vadd.xlane.f32.xlu1 %v285_v38  ;;  %283 = vadd.xlane.f32.xlu0 %v282_v39  ;;  %662 = vrcp.f32 %v96_v59 }
 0x3cf   :  { %v657_v0 = vpop.eup %656 }
 0x3d0   :  { %v123_v2 = vmul.f32 %v657_v0, %v537_v63 }
 0x3d1   :  { %v659_v3 = vpop.eup %658 }
 0x3d2   :  { %566 = vmatprep.subr.mxu0 %v123_v2  ;;  %v122_v5 = vmul.f32 %v659_v3, %v536_v1  ;;  %v661_v6 = vpop.eup %660 }
 0x3d3   :  { %567 = vmatpush3.msra.mxu0 %v123_v2  ;;  %v121_v8 = vmul.f32 %v661_v6, %v535_v4  ;;  %v663_v9 = vpop.eup %662 }
 0x3d4   :  { %568 = vmatprep.subr.mxu0 %v122_v5  ;;  %v120_v10 = vmul.f32 %v663_v9, %v534_v7 }
 0x3d5   :  { %569 = vmatpush3.msra.mxu0 %v122_v5 }
 0x3d6   :  { %570 = vmatprep.subr.mxu0 %v121_v8 }
 0x3d7   :  { %571 = vmatpush3.msra.mxu0 %v121_v8 }
 0x3d8   :  { %572 = vmatprep.subr.mxu0 %v120_v10 }
 0x3d9   :  { %573 = vmatpush3.msra.mxu0 %v120_v10 }
 0x44b   :  { %v281_v11 = vpop.xlane.xlu1 %280  ;;  %v278_v12 = vpop.xlane.xlu0 %277 }
 0x44c   :  { %664 = vrcp.f32 %v281_v11 }
 0x44d   :  { %666 = vrcp.f32 %v278_v12 }
 0x44f   :  { %v287_v13 = vpop.xlane.xlu1 %286  ;;  %v284_v14 = vpop.xlane.xlu0 %283 }
 0x450   :  { %668 = vrcp.f32 %v287_v13 }
 0x451   :  { %670 = vrcp.f32 %v284_v14 }
 0x459   :  { %v665_v15 = vpop.eup %664 }
 0x45a   :  { %v667_v16 = vpop.eup %666  ;;  %v291_v17 = vmul.f32 %v665_v15, %v809_v32 }
 0x45b   :  { %v289_v18 = vmul.f32 %v667_v16, %v811_v33 }
 0x45c   :  { %v297_v21 = vsel %vm44_vm0, %v291_v17, 0.0 }
 0x45d   :  { %v669_v19 = vpop.eup %668  ;;  %v296_v20 = vsel %vm44_vm0, %v289_v18, 0.0 }
 0x45e   :  { %v671_v22 = vpop.eup %670  ;;  %v295_v23 = vmul.f32 %v669_v19, %v817_v36  ;;  %v298_v25 = vadd.f32 %v297_v21, %v296_v20 }
 0x45f   :  { %v293_v24 = vmul.f32 %v671_v22, %v819_v37 }
 0x460   :  { %v301_v28 = vsel %vm44_vm0, %v295_v23, 0.0 }
 0x461   :  { %v299_v26 = vsel %vm44_vm0, %v293_v24, 0.0 }
 0x462   :  { %v300_v27 = vadd.f32 %v299_v26, %v298_v25 }
 0x464   :  { %v302_v29 = vadd.f32 %v301_v28, %v300_v27 }
 0x466   :  { %v303_v30 = vrot.slane %v302_v29, 4 }
 0x468   :  { %v304_v31 = vadd.f32 %v303_v30, %v302_v29 }
 0x46a   :  { %v305_v32 = vrot.slane %v304_v31, 2 }
 0x46c   :  { %v306_v33 = vadd.f32 %v305_v32, %v304_v31 }
 0x46e   :  { %v307_v34 = vrot.slane %v306_v33, 1 }
 0x470   :  { %v308_v35 = vadd.f32 %v307_v34, %v306_v33 }
 0x472   :  { %672 = vrcp.f32 %v308_v35 }
 0x47f   :  { %v673_v38 = vpop.eup %672 }
 0x480   :  { %v310_v39 = vmul.f32 %v673_v38, %v289_v18  ;;  %v313_v40 = vmul.f32 %v673_v38, %v295_v23  ;;  %v311_v36 = vmul.f32 %v673_v38, %v291_v17  ;;  %v312_v37 = vmul.f32 %v673_v38, %v293_v24 }
 0x482   :  { %574 = vmatprep.mubr.msk.f32.mxu0 %vm44_vm0, %v310_v39  ;;  %580 = vmatprep.subr.msk.mxu1 %vm44_vm0, %v313_v40 }
 0x483   :  { %575 = vmatmul.mubr.msk.f32.vlgmr.msra.gmra.mxu0 %vm44_vm0, %v311_v36  ;;  %581 = vmatpush3.xpose.msk.msra.mxu1 %vm44_vm0, %v313_v40 }
 0x484   :  { %577 = vmatprep.mubr.msk.f32.mxu0 %vm44_vm0, %v312_v37  ;;  %582 = vmatprep.subr.msk.mxu1 %vm44_vm0, %v312_v37 }
 0x487   :  { %578 = vmatmul.mubr.msk.f32.gmra.mxu0 %vm44_vm0, %v313_v40  ;;  %583 = vmatpush3.xpose.msk.msra.mxu1 %vm44_vm0, %v312_v37 }
 0x488   :  { %584 = vmatprep.subr.msk.mxu1 %vm44_vm0, %v311_v36 }
 0x48b   :  { %585 = vmatpush3.xpose.msk.msra.mxu1 %vm44_vm0, %v311_v36 }
 0x48c   :  { %586 = vmatprep.subr.msk.mxu1 %vm44_vm0, %v310_v39 }
 0x48f   :  { %587 = vmatpush3.xpose.msk.msra.mxu1 %vm44_vm0, %v310_v39 }
 0x543   :  { %v576_v41 = vpop.f32.mrf.mxu0 }
 0x545   :  { %v392_v42 = vpop.f32.mrf.mxu0 }
 0x546   :  { %588 = vmatprep.mubr.msk.f32.mxu1 %vm44_vm0, %v392_v42 }
 0x547   :  { %v579_v43 = vpop.f32.mrf.mxu0  ;;  %589 = vmatmul.mubr.msk.f32.vlgmr.msra.gmra.mxu1 %vm44_vm0, %v576_v41 }
 0x549   :  { %v402_v44 = vpop.f32.mrf.mxu0 }
 0x54a   :  { %591 = vmatprep.mubr.msk.f32.mxu1 %vm44_vm0, %v402_v44 }
 0x54b   :  { %592 = vmatmul.mubr.msk.f32.gmra.mxu1 %vm44_vm0, %v579_v43 }
 0x607   :  { %v590_v45 = vpop.f32.mrf.mxu1 }
 0x608   :  { %509 = vst.msk [vmem:[#allocation7 + $0x8] sm:$0xff] %vm44_vm0, %v590_v45 }
 0x609   :  { %v489_v46 = vpop.f32.mrf.mxu1 }
 0x60a   :  { %508 = vst.msk [vmem:[#allocation7] sm:$0xff] %vm44_vm0, %v489_v46 }
 0x60b   :  { %v593_v47 = vpop.f32.mrf.mxu1 }
 0x60c   :  { %511 = vst.msk [vmem:[#allocation7 + $0x18] sm:$0xff] %vm44_vm0, %v593_v47 }
 0x60d   :  { %v499_v48 = vpop.f32.mrf.mxu1 }
 0x60e   :  { %510 = vst.msk [vmem:[#allocation7 + $0x10] sm:$0xff] %vm44_vm0, %v499_v48 }
 0x60f   :  { %725 = shalt.err (!%p722_p0)
}
 0x610   :  { %523 = dma.vmem_to_hbm [thread:$0]  %s518_s1, 512, %s861_s2, [#allocation4], %s741_s12, %s741_s12, %s742_s13  }
 0x611   :  { %738 = dma.done.wait [#allocation4], 512  }
 0x612   :  { %739 = vsyncadd [#allocation4], 4294966784 }
 0x613   :  { %527 = vsyncpa [#allocation3], 1 }
 0x614   :  { %528 = vsyncpa [#allocation6], 1 }
 0x615   :  { %529 = vsyncpa [#allocation4], 1 }

</bundles_post_ra>
